<compile_context>
chip_gen: v7x
topology: tpu7x:2x2x1
jax: 0.10.0
libtpu: 0.0.40
codegen_flags: <defaults>
</compile_context>

<pallas_src>
import jax
import jax.numpy as jnp
from jax.experimental import pallas as pl
from jax.experimental.pallas import tpu as pltpu

_BN_EPS = 1e-5
_CH_ALIGN = 16                     # channel (sublane) padding, bf16-tile friendly
_TN_ALIGN = 512                    # lane-dense tile granularity (multiple of 128)
_TN_MAX = 4096
_TILE_BUDGET = 12 * 1024 * 1024    # target bytes for double-buffered x/out tiles


def _round_up(x, m):
    return (x + m - 1) // m * m


def _choose_tile_n(c2in_p, c2out_p, hwf):
    """Pick TN (multiple of 512) under the VMEM budget, minimising padding."""
    bytes_per_col = 2 * (c2in_p * 2 + c2out_p * 2)    # dbl-buffered bf16 in + bf16 out
    cap = max((_TILE_BUDGET // bytes_per_col) // _TN_ALIGN * _TN_ALIGN, _TN_ALIGN)
    cap = min(cap, _TN_MAX, _round_up(max(hwf, 1), _TN_ALIGN))
    candidates = list(range(_TN_ALIGN, cap + 1, _TN_ALIGN))
    padded = {tn: _round_up(hwf, tn) for tn in candidates}
    min_pad = min(padded.values())
    slack = min_pad + min_pad // 16                    # allow <= ~6% extra padding
    tn = max(t for t, p in padded.items() if p <= slack)
    return int(tn), int(padded[tn])


def _vmem_limit_bytes(c2in_p, c2out_p, tn):
    tiles = 2 * (c2in_p * tn * 2 + c2out_p * tn * 2)   # double-buffered bf16 tiles
    small = (c2in_p * c2in_p * 4 + c2out_p * c2in_p * 2
             + 4 * (c2in_p + c2out_p) * 4)
    need = tiles + small
    return int(min(max(2 * need, 16 << 20), 48 << 20))


# ---------------------------------------------------------------------------
# Pass 1: per-batch spectral moments (channel sum and Gram), batch-parallel.
# ---------------------------------------------------------------------------
def _moments_kernel(x_ref, gram_ref, sum_ref):
    @pl.when(pl.program_id(1) == 0)
    def _init():
        gram_ref[...] = jnp.zeros_like(gram_ref)
        sum_ref[...] = jnp.zeros_like(sum_ref)

    x = x_ref[...]                                    # [2C_in_p, TN] bf16
    # X @ X^T on the MXU with f32 accumulation.
    gram_ref[...] += jax.lax.dot_general(
        x, x, (((1,), (1,)), ((), ())), preferred_element_type=jnp.float32)
    sum_ref[...] += jnp.sum(x.astype(jnp.float32), axis=1, keepdims=True)


def _moments_pallas(x3, tn):
    b, c2in_p, np_tot = x3.shape
    n_tiles = np_tot // tn
    flops = 2 * c2in_p * c2in_p * b * np_tot + c2in_p * b * np_tot
    bytes_accessed = x3.size * 2 + b * (c2in_p * c2in_p + c2in_p) * 4
    return pl.pallas_call(
        _moments_kernel,
        out_shape=(
            jax.ShapeDtypeStruct((b, c2in_p, c2in_p), jnp.float32),
            jax.ShapeDtypeStruct((b, c2in_p, 1), jnp.float32),
        ),
        grid_spec=pltpu.PrefetchScalarGridSpec(
            num_scalar_prefetch=0,
            grid=(b, n_tiles),
            in_specs=[pl.BlockSpec((None, c2in_p, tn), lambda i, j: (i, 0, j))],
            out_specs=(
                pl.BlockSpec((None, c2in_p, c2in_p), lambda i, j: (i, 0, 0)),
                pl.BlockSpec((None, c2in_p, 1), lambda i, j: (i, 0, 0)),
            ),
        ),
        compiler_params=pltpu.CompilerParams(
            dimension_semantics=("parallel", "arbitrary"),
            vmem_limit_bytes=_vmem_limit_bytes(c2in_p, c2in_p, tn),
        ),
        cost_estimate=pl.CostEstimate(
            flops=int(flops), transcendentals=0, bytes_accessed=int(bytes_accessed)),
    )(x3)


# ---------------------------------------------------------------------------
# Pass 2: streaming 1x1 conv (bf16 MXU matmul) + folded BN scale/bias + ReLU.
# ---------------------------------------------------------------------------
def _conv_bn_relu_kernel(w_ref, scale_ref, bias_ref, x_ref, o_ref):
    y = jnp.dot(w_ref[...], x_ref[...], preferred_element_type=jnp.float32)
    o_ref[...] = jnp.maximum(
        y * scale_ref[...] + bias_ref[...], 0.0).astype(o_ref.dtype)


def _conv_bn_relu_pallas(w_p, scale, bias, x3, tn):
    b, c2in_p, np_tot = x3.shape
    c2out_p = w_p.shape[0]
    n_tiles = np_tot // tn
    flops = 2 * c2out_p * c2in_p * b * np_tot + 3 * c2out_p * b * np_tot
    bytes_accessed = (x3.size * 2 + b * c2out_p * np_tot * 2
                      + c2out_p * c2in_p * 2 + 2 * c2out_p * 4)
    return pl.pallas_call(
        _conv_bn_relu_kernel,
        out_shape=jax.ShapeDtypeStruct((b, c2out_p, np_tot), jnp.bfloat16),
        grid_spec=pltpu.PrefetchScalarGridSpec(
            num_scalar_prefetch=0,
            grid=(b, n_tiles),
            in_specs=[
                pl.BlockSpec((c2out_p, c2in_p), lambda i, j: (0, 0)),   # W (bf16, resident)
                pl.BlockSpec((c2out_p, 1), lambda i, j: (0, 0)),        # BN scale (f32)
                pl.BlockSpec((c2out_p, 1), lambda i, j: (0, 0)),        # BN bias  (f32)
                pl.BlockSpec((None, c2in_p, tn), lambda i, j: (i, 0, j)),  # X tile (bf16)
            ],
            out_specs=pl.BlockSpec((None, c2out_p, tn), lambda i, j: (i, 0, j)),
        ),
        compiler_params=pltpu.CompilerParams(
            dimension_semantics=("parallel", "parallel"),
            vmem_limit_bytes=_vmem_limit_bytes(c2in_p, c2out_p, tn),
        ),
        cost_estimate=pl.CostEstimate(
            flops=int(flops), transcendentals=0, bytes_accessed=int(bytes_accessed)),
    )(w_p, scale, bias, x3)


# ---------------------------------------------------------------------------
# Parameters (matches FourierUnit.__init__: kaiming_normal_ conv, BN affine).
# ---------------------------------------------------------------------------
def make_fourier_unit_params(key, in_channels, out_channels):
    cin2 = 2 * in_channels
    cout2 = 2 * out_channels
    fan_in = cin2                       # 1x1 kernel
    std = (2.0 / fan_in) ** 0.5
    w = std * jax.random.normal(key, (cout2, cin2), dtype=jnp.float32)
    gamma = jnp.ones((cout2,), dtype=jnp.float32)
    beta = jnp.zeros((cout2,), dtype=jnp.float32)
    return {"w": w, "gamma": gamma, "beta": beta}


# ---------------------------------------------------------------------------
# Forward.
# ---------------------------------------------------------------------------
def fourier_unit_forward(params, x):
    """FourierUnit forward.  x: [B, C_in, H, W] float32 (NCHW)."""
    b, c_in, h, w = x.shape
    w_conv = params["w"].astype(jnp.float32)
    gamma = params["gamma"].astype(jnp.float32).reshape(-1, 1)
    beta = params["beta"].astype(jnp.float32).reshape(-1, 1)
    c2out, c2in = w_conv.shape
    c_out = c2out // 2
    assert c2in == 2 * c_in

    # rfft2 over (H, W), ortho norm -> complex [B, C_in, H, W_f].
    ffted = jnp.fft.rfft2(x.astype(jnp.float32), s=(h, w), axes=(2, 3), norm="ortho")
    wf = ffted.shape[-1]
    hwf = h * wf
    n_valid = b * hwf

    # [B, 2C_in, H*W_f] in bf16 -- natural layout, no HBM transpose needed.
    spec = jnp.concatenate([ffted.real, ffted.imag], axis=1)
    spec = spec.reshape(b, c2in, hwf).astype(jnp.bfloat16)

    # Pad channels to 16 (bf16-tile friendly sublane count) and the lane axis
    # to the chosen tile size (zero padding, excluded from the statistics).
    c2in_p = _round_up(c2in, _CH_ALIGN)
    c2out_p = _round_up(c2out, _CH_ALIGN)
    tn, np_pad = _choose_tile_n(c2in_p, c2out_p, hwf)
    x3 = jnp.pad(spec, ((0, 0), (0, c2in_p - c2in), (0, np_pad - hwf)))

    # Conv weight: bf16 (MXU operand); the f32 copy of the *rounded* weight is
    # used for the statistics fold so stats match what the kernel computes.
    w_q = jnp.pad(w_conv, ((0, c2out_p - c2out), (0, c2in_p - c2in))).astype(jnp.bfloat16)
    w_stats = w_q.astype(jnp.float32)

    # Pass 1 (Pallas): per-batch moments (batch-parallel), reduced in tiny f32 JAX.
    gram_b, xsum_b = _moments_pallas(x3, tn)
    gram = jnp.sum(gram_b, axis=0)                            # [2C_in_p, 2C_in_p]
    xsum = jnp.sum(xsum_b, axis=0)                            # [2C_in_p, 1]

    # Fold training-mode BatchNorm (biased var, eps=1e-5) into scale/bias (f32).
    mean_x = xsum / n_valid                                   # [2C_in_p, 1]
    cov_x = gram / n_valid - mean_x @ mean_x.T                # [2C_in_p, 2C_in_p]
    mean_y = w_stats @ mean_x                                 # [2C_out_p, 1]
    var_y = jnp.sum((w_stats @ cov_x) * w_stats, axis=1, keepdims=True)
    var_y = jnp.maximum(var_y, 0.0)                           # guard cancellation
    gamma_p = jnp.pad(gamma, ((0, c2out_p - c2out), (0, 0)))
    beta_p = jnp.pad(beta, ((0, c2out_p - c2out), (0, 0)))
    scale = gamma_p * jax.lax.rsqrt(var_y + _BN_EPS)
    bias = beta_p - scale * mean_y

    # Pass 2 (Pallas): tiled, fully parallel conv + BN + ReLU (bf16 store).
    y3 = _conv_bn_relu_pallas(w_q, scale, bias, x3, tn)

    # Unpad, back to [B, 2C_out, H, W_f], split -> complex -> irfft2 ortho.
    y = y3[:, :c2out, :hwf].astype(jnp.float32).reshape(b, c2out, h, wf)
    y_complex = jax.lax.complex(y[:, :c_out], y[:, c_out:])
    out = jnp.fft.irfft2(y_complex, s=(h, w), axes=(2, 3), norm="ortho")
    return out.astype(x.dtype)


# Pure-JAX f32 reference (loose sanity check against bf16 streaming/stores).
def _fourier_unit_reference(params, x):
    b, c, h, w = x.shape
    w_conv = params["w"].astype(jnp.float32)
    gamma = params["gamma"].astype(jnp.float32)
    beta = params["beta"].astype(jnp.float32)
    c2out = w_conv.shape[0]
    c_out = c2out // 2
    ffted = jnp.fft.rfft2(x.astype(jnp.float32), s=(h, w), axes=(2, 3), norm="ortho")
    z = jnp.concatenate([ffted.real, ffted.imag], axis=1)
    y = jnp.einsum("oc,bchw->bohw", w_conv, z)
    mean = jnp.mean(y, axis=(0, 2, 3), keepdims=True)
    var = jnp.mean((y - mean) ** 2, axis=(0, 2, 3), keepdims=True)
    y = (y - mean) * jax.lax.rsqrt(var + _BN_EPS)
    y = y * gamma.reshape(1, -1, 1, 1) + beta.reshape(1, -1, 1, 1)
    y = jnp.maximum(y, 0.0)
    yc = jax.lax.complex(y[:, :c_out], y[:, c_out:])
    return jnp.fft.irfft2(yc, s=(h, w), axes=(2, 3), norm="ortho").astype(x.dtype)


if __name__ == "__main__":
    key = jax.random.PRNGKey(0)
    k_param, k_x = jax.random.split(key)

    B, C_in, C_out, H, W = 2, 4, 4, 16, 16
    params = make_fourier_unit_params(k_param, C_in, C_out)
    x = jax.random.normal(k_x, (B, C_in, H, W), dtype=jnp.float32)

    fwd = jax.jit(fourier_unit_forward)
    out = jax.block_until_ready(fwd(params, x))

    assert out.shape == (B, C_out, H, W), out.shape
    assert out.dtype == jnp.float32
    assert bool(jnp.all(jnp.isfinite(out)))

    # Loose sanity check vs a pure-JAX f32 reference (kernel streams in bf16).
    ref = jax.block_until_ready(_fourier_unit_reference(params, x))
    rel_l2 = jnp.linalg.norm(out - ref) / (jnp.linalg.norm(ref) + 1e-12)
    assert bool(rel_l2 < 5e-2), float(rel_l2)

    print("KERNEL_OK")
</pallas_src>

<mosaic_0001>
module attributes {stable_mosaic.version = 11 : i64} {
  func.func @_moments_kernel(%arg0: i32, %arg1: i32, %arg2: memref<1x16x512xbf16, #tpu.memory_space<vmem>>, %arg3: memref<1x16x16xf32, #tpu.memory_space<vmem>>, %arg4: memref<1x16x1xf32, #tpu.memory_space<vmem>>) attributes {dimension_semantics = [#tpu.dimension_semantics<parallel>, #tpu.dimension_semantics<arbitrary>], iteration_bounds = array<i64: 2, 1>, scalar_prefetch = 0 : i64, scratch_operands = 0 : i64, tpu.core_type = #tpu.core_type<tc>, window_params = [{transform_indices = @transform_0, window_bounds = array<i64: 1, 16, 512>}, {transform_indices = @transform_1, window_bounds = array<i64: 1, 16, 16>}, {transform_indices = @transform_2, window_bounds = array<i64: 1, 16, 1>}]} {
    %c0_i32 = arith.constant 0 : i32
    %0 = arith.cmpi eq, %arg1, %c0_i32 : i32
    %1 = arith.extui %0 : i1 to i32
    %c0_i32_0 = arith.constant 0 : i32
    %2 = arith.cmpi ne, %1, %c0_i32_0 : i32
    scf.if %2 {
      %cst_16 = arith.constant 0.000000e+00 : f32
      %21 = vector.broadcast %cst_16 : f32 to vector<16x16xf32>
      %c0_17 = arith.constant 0 : index
      %c0_18 = arith.constant 0 : index
      %c0_19 = arith.constant 0 : index
      %22 = vector.load %arg3[%c0_17, %c0_18, %c0_19] : memref<1x16x16xf32, #tpu.memory_space<vmem>>, vector<1x16x16xf32>
      %23 = vector.shape_cast %22 : vector<1x16x16xf32> to vector<16x16xf32>
      %24 = vector.shape_cast %21 : vector<16x16xf32> to vector<1x16x16xf32>
      tpu.vector_store %arg3[%c0_17, %c0_18, %c0_19], %24 {strides = array<i32>} : memref<1x16x16xf32, #tpu.memory_space<vmem>>, vector<1x16x16xf32>,
      %cst_20 = arith.constant 0.000000e+00 : f32
      %25 = vector.broadcast %cst_20 : f32 to vector<16x1xf32>
      %c0_21 = arith.constant 0 : index
      %c0_22 = arith.constant 0 : index
      %c0_23 = arith.constant 0 : index
      %26 = vector.load %arg4[%c0_21, %c0_22, %c0_23] : memref<1x16x1xf32, #tpu.memory_space<vmem>>, vector<1x16x1xf32>
      %27 = vector.shape_cast %26 : vector<1x16x1xf32> to vector<16x1xf32>
      %28 = vector.shape_cast %25 : vector<16x1xf32> to vector<1x16x1xf32>
      tpu.vector_store %arg4[%c0_21, %c0_22, %c0_23], %28 {strides = array<i32>} : memref<1x16x1xf32, #tpu.memory_space<vmem>>, vector<1x16x1xf32>,
    } else {
    }
    %c0 = arith.constant 0 : index
    %c0_1 = arith.constant 0 : index
    %c0_2 = arith.constant 0 : index
    %3 = vector.load %arg2[%c0, %c0_1, %c0_2] : memref<1x16x512xbf16, #tpu.memory_space<vmem>>, vector<1x16x512xbf16>
    %4 = vector.shape_cast %3 : vector<1x16x512xbf16> to vector<16x512xbf16>
    %c0_3 = arith.constant 0 : index
    %c0_4 = arith.constant 0 : index
    %c0_5 = arith.constant 0 : index
    %5 = vector.load %arg3[%c0_3, %c0_4, %c0_5] : memref<1x16x16xf32, #tpu.memory_space<vmem>>, vector<1x16x16xf32>
    %6 = vector.shape_cast %5 : vector<1x16x16xf32> to vector<16x16xf32>
    %cst = arith.constant dense<0.000000e+00> : vector<16x16xf32>
    %7 = tpu.matmul %4, %4, %cst {dimension_numbers = #tpu.dot_dimension_numbers<[1], [1], [0], [0], [0, 0, 1, 0], [], []>} : vector<16x512xbf16>, vector<16x512xbf16>, vector<16x16xf32> -> vector<16x16xf32>
    %8 = arith.addf %6, %7 : vector<16x16xf32>
    %c0_6 = arith.constant 0 : index
    %c0_7 = arith.constant 0 : index
    %c0_8 = arith.constant 0 : index
    %9 = vector.load %arg3[%c0_6, %c0_7, %c0_8] : memref<1x16x16xf32, #tpu.memory_space<vmem>>, vector<1x16x16xf32>
    %10 = vector.shape_cast %9 : vector<1x16x16xf32> to vector<16x16xf32>
    %11 = vector.shape_cast %8 : vector<16x16xf32> to vector<1x16x16xf32>
    tpu.vector_store %arg3[%c0_6, %c0_7, %c0_8], %11 {strides = array<i32>} : memref<1x16x16xf32, #tpu.memory_space<vmem>>, vector<1x16x16xf32>,
    %c0_9 = arith.constant 0 : index
    %c0_10 = arith.constant 0 : index
    %c0_11 = arith.constant 0 : index
    %12 = vector.load %arg4[%c0_9, %c0_10, %c0_11] : memref<1x16x1xf32, #tpu.memory_space<vmem>>, vector<1x16x1xf32>
    %13 = vector.shape_cast %12 : vector<1x16x1xf32> to vector<16x1xf32>
    %14 = arith.extf %4 : vector<16x512xbf16> to vector<16x512xf32>
    %cst_12 = arith.constant dense<0.000000e+00> : vector<16xf32>
    %15 = vector.multi_reduction <add>, %14, %cst_12 [1] : vector<16x512xf32> to vector<16xf32>
    %16 = vector.shape_cast %15 : vector<16xf32> to vector<16x1xf32>
    %17 = arith.addf %13, %16 : vector<16x1xf32>
    %c0_13 = arith.constant 0 : index
    %c0_14 = arith.constant 0 : index
    %c0_15 = arith.constant 0 : index
    %18 = vector.load %arg4[%c0_13, %c0_14, %c0_15] : memref<1x16x1xf32, #tpu.memory_space<vmem>>, vector<1x16x1xf32>
    %19 = vector.shape_cast %18 : vector<1x16x1xf32> to vector<16x1xf32>
    %20 = vector.shape_cast %17 : vector<16x1xf32> to vector<1x16x1xf32>
    tpu.vector_store %arg4[%c0_13, %c0_14, %c0_15], %20 {strides = array<i32>} : memref<1x16x1xf32, #tpu.memory_space<vmem>>, vector<1x16x1xf32>,
    return
  }
  func.func @transform_0(%arg0: i32, %arg1: i32) -> (i32, i32, i32) {
    %c0_i32 = arith.constant 0 : i32
    %c0_i32_0 = arith.constant 0 : i32
    return %arg0, %c0_i32, %arg1 : i32, i32, i32
  }
  func.func @transform_1(%arg0: i32, %arg1: i32) -> (i32, i32, i32) {
    %c0_i32 = arith.constant 0 : i32
    %c0_i32_0 = arith.constant 0 : i32
    %c0_i32_1 = arith.constant 0 : i32
    return %arg0, %c0_i32, %c0_i32_0 : i32, i32, i32
  }
  func.func @transform_2(%arg0: i32, %arg1: i32) -> (i32, i32, i32) {
    %c0_i32 = arith.constant 0 : i32
    %c0_i32_0 = arith.constant 0 : i32
    %c0_i32_1 = arith.constant 0 : i32
    return %arg0, %c0_i32, %c0_i32_0 : i32, i32, i32
  }
}

module attributes {stable_mosaic.version = 11 : i64} {
  func.func @_conv_bn_relu_kernel(%arg0: i32, %arg1: i32, %arg2: memref<16x16xbf16, #tpu.memory_space<vmem>>, %arg3: memref<16x1xf32, #tpu.memory_space<vmem>>, %arg4: memref<16x1xf32, #tpu.memory_space<vmem>>, %arg5: memref<1x16x512xbf16, #tpu.memory_space<vmem>>, %arg6: memref<1x16x512xbf16, #tpu.memory_space<vmem>>) attributes {dimension_semantics = [#tpu.dimension_semantics<parallel>, #tpu.dimension_semantics<parallel>], iteration_bounds = array<i64: 2, 1>, scalar_prefetch = 0 : i64, scratch_operands = 0 : i64, tpu.core_type = #tpu.core_type<tc>, window_params = [{pipeline_mode = #tpu.pipeline_mode<synchronous>, transform_indices = @transform_0, window_bounds = array<i64: 16, 16>}, {pipeline_mode = #tpu.pipeline_mode<synchronous>, transform_indices = @transform_1, window_bounds = array<i64: 16, 1>}, {pipeline_mode = #tpu.pipeline_mode<synchronous>, transform_indices = @transform_2, window_bounds = array<i64: 16, 1>}, {transform_indices = @transform_3, window_bounds = array<i64: 1, 16, 512>}, {transform_indices = @transform_4, window_bounds = array<i64: 1, 16, 512>}]} {
    %c0 = arith.constant 0 : index
    %c0_0 = arith.constant 0 : index
    %0 = vector.load %arg2[%c0, %c0_0] : memref<16x16xbf16, #tpu.memory_space<vmem>>, vector<16x16xbf16>
    %c0_1 = arith.constant 0 : index
    %c0_2 = arith.constant 0 : index
    %c0_3 = arith.constant 0 : index
    %1 = vector.load %arg5[%c0_1, %c0_2, %c0_3] : memref<1x16x512xbf16, #tpu.memory_space<vmem>>, vector<1x16x512xbf16>
    %2 = vector.shape_cast %1 : vector<1x16x512xbf16> to vector<16x512xbf16>
    %cst = arith.constant dense<0.000000e+00> : vector<16x512xf32>
    %3 = tpu.matmul %0, %2, %cst {dimension_numbers = #tpu.dot_dimension_numbers<[1], [0], [0], [1], [0, 0, 1, 1], [], []>} : vector<16x16xbf16>, vector<16x512xbf16>, vector<16x512xf32> -> vector<16x512xf32>
    %c0_4 = arith.constant 0 : index
    %c0_5 = arith.constant 0 : index
    %4 = vector.load %arg3[%c0_4, %c0_5] : memref<16x1xf32, #tpu.memory_space<vmem>>, vector<16x1xf32>
    %5 = vector.broadcast %4 : vector<16x1xf32> to vector<16x512xf32>
    %6 = arith.mulf %3, %5 : vector<16x512xf32>
    %c0_6 = arith.constant 0 : index
    %c0_7 = arith.constant 0 : index
    %7 = vector.load %arg4[%c0_6, %c0_7] : memref<16x1xf32, #tpu.memory_space<vmem>>, vector<16x1xf32>
    %8 = vector.broadcast %7 : vector<16x1xf32> to vector<16x512xf32>
    %9 = arith.addf %6, %8 : vector<16x512xf32>
    %cst_8 = arith.constant 0.000000e+00 : f32
    %10 = vector.broadcast %cst_8 : f32 to vector<16x512xf32>
    %11 = arith.maximumf %9, %10 : vector<16x512xf32>
    %12 = arith.truncf %11 : vector<16x512xf32> to vector<16x512xbf16>
    %c0_9 = arith.constant 0 : index
    %c0_10 = arith.constant 0 : index
    %c0_11 = arith.constant 0 : index
    %13 = vector.load %arg6[%c0_9, %c0_10, %c0_11] : memref<1x16x512xbf16, #tpu.memory_space<vmem>>, vector<1x16x512xbf16>
    %14 = vector.shape_cast %13 : vector<1x16x512xbf16> to vector<16x512xbf16>
    %15 = vector.shape_cast %12 : vector<16x512xbf16> to vector<1x16x512xbf16>
    tpu.vector_store %arg6[%c0_9, %c0_10, %c0_11], %15 {strides = array<i32>} : memref<1x16x512xbf16, #tpu.memory_space<vmem>>, vector<1x16x512xbf16>,
    return
  }
  func.func @transform_0(%arg0: i32, %arg1: i32) -> (i32, i32) {
    %c0_i32 = arith.constant 0 : i32
    %c0_i32_0 = arith.constant 0 : i32
    %c0_i32_1 = arith.constant 0 : i32
    return %c0_i32, %c0_i32_0 : i32, i32
  }
  func.func @transform_1(%arg0: i32, %arg1: i32) -> (i32, i32) {
    %c0_i32 = arith.constant 0 : i32
    %c0_i32_0 = arith.constant 0 : i32
    %c0_i32_1 = arith.constant 0 : i32
    return %c0_i32, %c0_i32_0 : i32, i32
  }
  func.func @transform_2(%arg0: i32, %arg1: i32) -> (i32, i32) {
    %c0_i32 = arith.constant 0 : i32
    %c0_i32_0 = arith.constant 0 : i32
    %c0_i32_1 = arith.constant 0 : i32
    return %c0_i32, %c0_i32_0 : i32, i32
  }
  func.func @transform_3(%arg0: i32, %arg1: i32) -> (i32, i32, i32) {
    %c0_i32 = arith.constant 0 : i32
    %c0_i32_0 = arith.constant 0 : i32
    return %arg0, %c0_i32, %arg1 : i32, i32, i32
  }
  func.func @transform_4(%arg0: i32, %arg1: i32) -> (i32, i32, i32) {
    %c0_i32 = arith.constant 0 : i32
    %c0_i32_0 = arith.constant 0 : i32
    return %arg0, %c0_i32, %arg1 : i32, i32, i32
  }
}

</mosaic_0001>

<bundles_post_ra>
// kernel: fourier_unit_forward.2
= control target key start
LH: loop header
LB: loop body
LE: loop exit
PB: predicated region body
PF: predicated region fallthrough
CT: control target
= control target key end

     0   :  { %s525_s9 = smov 0   ;;  %s527_s10 = smov 0   ;;  %s569_s0 = inlined_call_operand.vmem [shape: bf16[2,16,512], index: 0, kind: input, shape index: {}]   ;;  %s570_s1 = inlined_call_operand.vmem [shape: f32[2,16,16], index: 1, kind: output, shape index: {0}]   ;;  %s571_s2 = inlined_call_operand.vmem [shape: f32[2,16,1], index: 2, kind: output, shape index: {1}]  }
   0x1   :  { %s529_s11 = smov 0  }
   0x2 LB: > { %s25_s12 = sadd.s32 1, %s503_s10  ;;  %p440_p0 = scmp.ge.s32.totalorder %s507_s11, 1  ;;  %s507_s11 = sphi %s529_s11, %s13_s11   ;;  %s503_s10 = sphi %s527_s10, %s573_s10   ;;  %s499_s9 = sphi %s525_s9, %s572_s9  }
   0x3   : > { %p27_p1 = scmp.ge.s32.totalorder %s25_s12, 2  ;;  %p134_p2 = scmp.lt.s32.totalorder %s507_s11, 3 }
   0x5   : > { %s575_s12 = smov (%p27_p1, %s25_s12), 0  ;;  %p135_p3 = pnand %p440_p0, %p134_p2 }
   0x6   : > { %p166_p4 = scmp.lt.s32.totalorder (!%p135_p3), %s499_s9, 1  ;;  %vm193_vm0 = vcmask (!%p135_p3), 7168   ;;  %v509_v22 = vmov (!%p135_p3), 0.0   ;;  %vm190_vm1 = vcmask (!%p135_p3), 130048  }
   0x7   : > { %138 = sbr.rel (%p135_p3) target bundleno = 248 (0xf8), region = 24 }
   0xe   : > { %s577_s9 = smov (!%p166_p4, %s499_s9), 1 }
   0xf   : > { %s453_s13 = sshll.u32 %s577_s9, 5  ;;  %s454_s17 = sshll.u32 %s577_s9, 4 }
  0x10   : > { %s173_s16 = scalar_lea.vmem %s569_s0, %s453_s13  ;;  %s184_s20 = scalar_lea.vmem %s571_s2, %s454_s17 }
  0x11   : > { %v196_v0 = vld [vmem:[%s173_s16] sm:$0xff]  ;;  %v198_v1 = vld [vmem:[%s173_s16 + $0x10] sm:$0xff]  ;;  %v197_v2 = vld [vmem:[%s173_s16 + $0x8] sm:$0xff]  ;;  %194 = vst.msk [vmem:[%s184_s20] sm:$0xff] %vm193_vm0, %v509_v22  ;;  %s179_s23 = scalar_lea.vmem %s570_s1, %s454_s17 }
  0x12   : > { %v448_v3 = vcombine.high %v196_v0, %v198_v1  ;;  %v199_v4 = vld [vmem:[%s173_s16 + $0x18] sm:$0xff]  ;;  %v447_v5 = vcombine.low %v196_v0, %v198_v1  ;;  %v311_v6 = vunpack.c.l.bf16 %v196_v0  ;;  %v312_v7 = vunpack.c.h.bf16 %v196_v0  ;;  %195 = vst.msk [vmem:[%s184_s20 + $0x8] sm:$0xff] %vm193_vm0, %v509_v22 }
  0x13   : > { %v450_v8 = vcombine.high %v197_v2, %v199_v4  ;;  %v449_v9 = vcombine.low %v197_v2, %v199_v4  ;;  %v313_v10 = vunpack.c.l.bf16 %v197_v2  ;;  %v314_v11 = vunpack.c.h.bf16 %v197_v2  ;;  %191 = vst.msk [vmem:[%s179_s23] sm:$0xff] %vm190_vm1, %v509_v22  ;;  %192 = vst.msk [vmem:[%s179_s23 + $0x8] sm:$0xff] %vm190_vm1, %v509_v22 }
  0x14   : > { %222 = vmatprep.subr.bf16.mxu0 %v448_v3  ;;  %254 = vmatprep.mubr.bf16.mxu0 %v448_v3  ;;  %v319_v12 = vadd.f32 %v312_v7, %v311_v6  ;;  %v315_v13 = vunpack.c.l.bf16 %v198_v1  ;;  %v316_v14 = vunpack.c.h.bf16 %v198_v1  ;;  %v317_v15 = vunpack.c.l.bf16 %v199_v4 }
  0x15   : > { %263 = vmatprep.subr.bf16.mxu1 %v450_v8  ;;  %223 = vmatpush1.bf16.xpose.msra.mxu0 %v447_v5  ;;  %v318_v17 = vunpack.c.h.bf16 %v199_v4 }
  0x16   : > { %264 = vmatpush1.bf16.xpose.msra.mxu1 %v449_v9  ;;  %295 = vmatprep.mubr.bf16.mxu1 %v450_v8  ;;  %v320_v16 = vadd.f32 %v319_v12, %v313_v10  ;;  %v324_v18 = vadd.f32 %v316_v14, %v315_v13 }
  0x18   : > { %v321_v19 = vadd.f32 %v320_v16, %v314_v11  ;;  %v325_v20 = vadd.f32 %v324_v18, %v317_v15  ;;  %v309_v23 = vld [vmem:[%s184_s20] sm:$0xff] }
  0x19   : > { %v310_v26 = vld [vmem:[%s184_s20 + $0x8] sm:$0xff] }
  0x1a   : > { %322 = vadd.xlane.f32.xlu0 %v321_v19  ;;  %v326_v21 = vadd.f32 %v325_v20, %v318_v17  ;;  %v200_v31 = vld [vmem:[%s179_s23] sm:$0xff]  ;;  %v201_v36 = vld [vmem:[%s179_s23 + $0x8] sm:$0xff] }
  0x1c   : > { %255 = vmatmul.mubr.bf16.vlgmr.msra.gmra.mrb[0].mxu0 %v447_v5 }
  0x1d   : > { %296 = vmatmul.mubr.bf16.vlgmr.msra.gmra.mrb[0].mxu1 %v449_v9 }
  0x1e   : > { %327 = vadd.xlane.f32.xlu0 %v326_v21 }
  0xa7   : > { %v323_v24 = vpop.xlane.xlu0 %322 }
  0xa8   : > { %v329_v25 = vadd.f32 %v323_v24, %v309_v23 }
  0xaa   : > { %332 = vst.msk [vmem:[%s184_s20] sm:$0xff] %vm193_vm0, %v329_v25 }
  0xab   : > { %v328_v27 = vpop.xlane.xlu0 %327 }
  0xac   : > { %v330_v28 = vadd.f32 %v328_v27, %v310_v26 }
  0xae   : > { %333 = vst.msk [vmem:[%s184_s20 + $0x8] sm:$0xff] %vm193_vm0, %v330_v28 }
  0xef   : > { %v256_v29 = vpop.f32.mrb[0].mxu0 }
  0xf0   : > { %v297_v30 = vpop.f32.mrb[0].mxu1  ;;  %v258_v32 = vpop.f32.mrb[1].mxu0 }
  0xf1   : > { %v298_v33 = vadd.f32 %v297_v30, %v256_v29  ;;  %v299_v34 = vpop.f32.mrb[1].mxu1  ;;  %v259_v35 = vpop.f32.mrb[2].mxu0 }
  0xf2   : > { %v300_v37 = vpop.f32.mrb[2].mxu1  ;;  %v261_v38 = vpop.f32.mrb[3].mxu0 }
  0xf3   : > { %v304_v39 = vadd.f32 %v298_v33, %v200_v31  ;;  %v301_v40 = vadd.f32 %v300_v37, %v259_v35  ;;  %v302_v41 = vpop.f32.mrb[3].mxu1 }
  0xf5   : > { %307 = vst.msk [vmem:[%s179_s23] sm:$0xff] %vm190_vm1, %v304_v39  ;;  %v305_v42 = vadd.f32 %v301_v40, %v201_v36 }
  0xf7   : > { %308 = vst.msk [vmem:[%s179_s23 + $0x8] sm:$0xff] %vm190_vm1, %v305_v42 }
  0xf8 PF: > { %s13_s11 = sadd.s32 1, %s507_s11   ;;  %s572_s9 = smov %s503_s10 }
  0xf9   : > { %p10_p5 = scmp.ge.s32.totalorder %s13_s11, 4   ;;  %s573_s10 = smov %s575_s12 }
  0xfb   :  { %12 = sbr.rel (!%p10_p5) target bundleno = 2 (0x2), region = 70 }

// kernel: fourier_unit_forward.3
= control target key start
LH: loop header
LB: loop body
LE: loop exit
PB: predicated region body
PF: predicated region fallthrough
CT: control target
= control target key end

     0   :  { %s634_s15 = smov 0   ;;  %s636_s16 = smov 0   ;;  %s689_s0 = inlined_call_operand.vmem [shape: bf16[16,16], index: 0, kind: input, shape index: {}]   ;;  %s690_s1 = inlined_call_operand.vmem [shape: f32[16,1], index: 1, kind: input, shape index: {}]   ;;  %s691_s2 = inlined_call_operand.vmem [shape: f32[16,1], index: 2, kind: input, shape index: {}]   ;;  %s692_s3 = inlined_call_operand.vmem [shape: bf16[2,16,512], index: 3, kind: input, shape index: {}]   ;;  %s693_s4 = inlined_call_operand.vmem [shape: bf16[2,16,512], index: 4, kind: output, shape index: {}]  }
   0x1   :  { %s638_s17 = smov 0  }
   0x2 LB: > { %s26_s18 = sadd.s32 1, %s602_s16  ;;  %p526_p0 = scmp.ge.s32.totalorder %s606_s17, 1  ;;  %s606_s17 = sphi %s638_s17, %s14_s17   ;;  %s602_s16 = sphi %s636_s16, %s695_s16   ;;  %s598_s15 = sphi %s634_s15, %s694_s15  }
   0x3   : > { %p28_p1 = scmp.ge.s32.totalorder %s26_s18, 2  ;;  %p183_p2 = scmp.lt.s32.totalorder %s606_s17, 3 }
   0x5   : > { %s697_s18 = smov (%p28_p1, %s26_s18), 0  ;;  %p184_p3 = pnand %p526_p0, %p183_p2 }
   0x6   : > { %p218_p4 = scmp.lt.s32.totalorder (!%p184_p3), %s598_s15, 1  ;;  %v608_v0 = vmov (!%p184_p3), 0   ;;  %v359_v1 = vld [vmem:[%s690_s1] sm:$0xff] (!%p184_p3)  ;;  %v360_v3 = vld [vmem:[%s690_s1 + $0x8] sm:$0xff] (!%p184_p3)  ;;  %vm269_vm0 = vcmask (!%p184_p3), 130048  }
   0x7   : > { %187 = sbr.rel (%p184_p3) target bundleno = 246 (0xf6), region = 36  ;;  %305 = vmatprep.mubr.bf16.mxu0 (!%p184_p3), %v608_v0  ;;  %348 = vmatprep.mubr.bf16.mxu1 (!%p184_p3), %v608_v0  ;;  %v379_v2 = vld [vmem:[%s691_s2] sm:$0xff] (!%p184_p3)  ;;  %v380_v4 = vld [vmem:[%s691_s2 + $0x8] sm:$0xff] (!%p184_p3) }
   0x8   : > { %575 = vset.pattern.permute.xlu0 (!%p184_p3), %v608_v0  ;;  %576 = vset.pattern.permute.xlu1 (!%p184_p3), %v608_v0  ;;  %v583_v9 = vld [vmem:[%s689_s0] sm:$0xff] (!%p184_p3)  }
   0x9   : > { %363 = vperm.xlu0 (!%p184_p3), %575, %v359_v1   ;;  %383 = vperm.xlu1 (!%p184_p3), %576, %v379_v2  }
   0xd   : > { %368 = vperm.xlu0 (!%p184_p3), %575, %v360_v3   ;;  %388 = vperm.xlu1 (!%p184_p3), %576, %v380_v4  }
   0xe   : > { %s699_s15 = smov (!%p218_p4, %s598_s15), 1 }
   0xf   : > { %s544_s23 = sshll.u32 %s699_s15, 5 }
  0x10   : > { %s225_s30 = scalar_lea.vmem %s692_s3, %s544_s23  ;;  %s235_s9 = scalar_lea.vmem %s693_s4, %s544_s23 }
  0x11   : > { %v577_v5 = vld [vmem:[%s225_s30 + $0x4] ss:$16 sps:$4 sm:$0xff]   ;;  %v579_v6 = vld [vmem:[%s225_s30 + $0xc] ss:$16 sps:$4 sm:$0xff]   ;;  %v581_v7 = vld [vmem:[%s225_s30] ss:$16 sps:$4 sm:$0xff]  }
  0x12   : > { %273 = vmatprep.subr.bf16.mxu0 %v577_v5  ;;  %v582_v8 = vld [vmem:[%s225_s30 + $0x8] ss:$16 sps:$4 sm:$0xff]   ;;  %316 = vmatprep.subr.bf16.mxu1 %v579_v6 }
  0x13   : > { %274 = vmatpush1.bf16.msra.mxu0 %v581_v7  ;;  %317 = vmatpush1.bf16.msra.mxu1 %v582_v8 }
  0x16   : > { %536 = vmatmul.mubr.msk.bf16.vlgmr.msra.gmra.mrb[0].mxu0 %vm269_vm0, %v583_v9  ;;  %537 = vmatmul.mubr.msk.bf16.vlgmr.msra.gmra.mrb[0].mxu1 %vm269_vm0, %v583_v9 }
  0x88   : > { %v364_v10 = vpop.permute.xlu0 %363  ;;  %v384_v11 = vpop.permute.xlu1 %383 }
  0x8c   : > { %v369_v12 = vpop.permute.xlu0 %368  ;;  %v389_v29 = vpop.permute.xlu1 %388 }
  0xe9   : > { %v307_v13 = vpop.f32.mrb[0].mxu0  ;;  %v350_v14 = vpop.f32.mrb[0].mxu1 }
  0xea   : > { %v371_v15 = vmul.f32 %v364_v10, %v307_v13  ;;  %v373_v16 = vmul.f32 %v364_v10, %v350_v14  ;;  %v309_v17 = vpop.f32.mrb[1].mxu0  ;;  %v352_v18 = vpop.f32.mrb[1].mxu1 }
  0xeb   : > { %v372_v19 = vmul.f32 %v364_v10, %v309_v17  ;;  %v374_v20 = vmul.f32 %v364_v10, %v352_v18  ;;  %v311_v21 = vpop.f32.mrb[2].mxu0  ;;  %v354_v22 = vpop.f32.mrb[2].mxu1 }
  0xec   : > { %v391_v23 = vadd.f32 %v384_v11, %v371_v15  ;;  %v393_v24 = vadd.f32 %v384_v11, %v373_v16  ;;  %v375_v25 = vmul.f32 %v369_v12, %v311_v21  ;;  %v377_v26 = vmul.f32 %v369_v12, %v354_v22  ;;  %v313_v27 = vpop.f32.mrb[3].mxu0  ;;  %v356_v28 = vpop.f32.mrb[3].mxu1 }
  0xed   : > { %v392_v30 = vadd.f32 %v384_v11, %v372_v19  ;;  %v394_v31 = vadd.f32 %v384_v11, %v374_v20  ;;  %v376_v32 = vmul.f32 %v369_v12, %v313_v27  ;;  %v378_v33 = vmul.f32 %v369_v12, %v356_v28 }
  0xee   : > { %v399_v34 = vmax.f32 %v391_v23, 0.0  ;;  %v401_v35 = vmax.f32 %v393_v24, 0.0  ;;  %v395_v36 = vadd.f32 %v389_v29, %v375_v25  ;;  %v397_v37 = vadd.f32 %v389_v29, %v377_v26 }
  0xef   : > { %v400_v38 = vmax.f32 %v392_v30, 0.0  ;;  %v402_v39 = vmax.f32 %v394_v31, 0.0  ;;  %v396_v40 = vadd.f32 %v389_v29, %v376_v32  ;;  %v398_v41 = vadd.f32 %v389_v29, %v378_v33 }
  0xf0   : > { %v403_v42 = vmax.f32 %v395_v36, 0.0  ;;  %v405_v43 = vmax.f32 %v397_v37, 0.0 }
  0xf1   : > { %v546_v44 = vpack.c.bf16 %v400_v38, %v399_v34  ;;  %v547_v45 = vpack.c.bf16 %v402_v39, %v401_v35  ;;  %v404_v46 = vmax.f32 %v396_v40, 0.0  ;;  %v406_v47 = vmax.f32 %v398_v41, 0.0 }
  0xf3   : > { %431 = vst [vmem:[%s235_s9] sm:$0xff] %v546_v44  ;;  %432 = vst [vmem:[%s235_s9 + $0x8] sm:$0xff] %v547_v45  ;;  %v548_v48 = vpack.c.bf16 %v404_v46, %v403_v42  ;;  %v549_v49 = vpack.c.bf16 %v406_v47, %v405_v43 }
  0xf5   : > { %433 = vst [vmem:[%s235_s9 + $0x10] sm:$0xff] %v548_v48  ;;  %434 = vst [vmem:[%s235_s9 + $0x18] sm:$0xff] %v549_v49 }
  0xf6 PF: > { %s14_s17 = sadd.s32 1, %s606_s17   ;;  %s694_s15 = smov %s602_s16 }
  0xf7   : > { %p11_p5 = scmp.ge.s32.totalorder %s14_s17, 4   ;;  %s695_s16 = smov %s697_s18 }
  0xf9   :  { %13 = sbr.rel (!%p11_p5) target bundleno = 2 (0x2), region = 66 }

// kernel: reverse.0
= control target key start
LH: loop header
LB: loop body
LE: loop exit
PB: predicated region body
PF: predicated region fallthrough
CT: control target
= control target key end

     0   :  { %v71_v3 = vlaneseq  ;;  %v64_v9 = vld [vmem:[#allocation0 + $0x7] ss:$-1 sm:$0xff]  ;;  %v78_v12 = vld [vmem:[#allocation0 + $0x17] ss:$-1 sm:$0xff]  ;;  %s329_s0 = inlined_call_operand.vmem [shape: f32[2,4,16,7], index: 0, kind: input, shape index: {}]   ;;  %s330_s1 = inlined_call_operand.vmem [shape: f32[2,4,16,7], index: 1, kind: output, shape index: {}]  }
   0x1   :  { %v44_v0 = vld [vmem:[%s329_s0] sm:$0xff]  ;;  %v46_v1 = vld [vmem:[%s329_s0 + $0x8] sm:$0xff]  ;;  %v48_v2 = vld [vmem:[%s329_s0 + $0x10] sm:$0xff]  ;;  %v65_v10 = vrot.slane %v64_v9, 1  ;;  %v79_v14 = vrot.slane %v78_v12, 1 }
   0x2   :  { %45 = vst [vmem:[#allocation0 + $0x8] sm:$0xff] %v44_v0  ;;  %47 = vst [vmem:[#allocation0 + $0x18] sm:$0xff] %v46_v1  ;;  %v50_v4 = vld [vmem:[%s329_s0 + $0x18] sm:$0xff]  ;;  %v52_v5 = vld [vmem:[%s329_s0 + $0x20] sm:$0xff]  ;;  %v72_v11 = vshrl.u32 %v71_v3, 7 }
   0x3   :  { %49 = vst [vmem:[#allocation0 + $0x28] sm:$0xff] %v48_v2  ;;  %v54_v6 = vld [vmem:[%s329_s0 + $0x28] sm:$0xff]  ;;  %51 = vst [vmem:[#allocation0 + $0x38] sm:$0xff] %v50_v4  ;;  %v56_v7 = vld [vmem:[%s329_s0 + $0x30] sm:$0xff] }
   0x4   :  { %53 = vst [vmem:[#allocation0 + $0x48] sm:$0xff] %v52_v5  ;;  %55 = vst [vmem:[#allocation0 + $0x58] sm:$0xff] %v54_v6  ;;  %v58_v8 = vld [vmem:[%s329_s0 + $0x38] sm:$0xff]  ;;  %v92_v13 = vld [vmem:[#allocation0 + $0x27] ss:$-1 sm:$0xff]  ;;  %vm73_vm0 = vcmp.lt.s32.totalorder %v72_v11, 7 }
   0x5   :  { %57 = vst [vmem:[#allocation0 + $0x68] sm:$0xff] %v56_v7  ;;  %59 = vst [vmem:[#allocation0 + $0x78] sm:$0xff] %v58_v8  ;;  %v93_v15 = vrot.slane %v92_v13, 1  ;;  %v106_v16 = vld [vmem:[#allocation0 + $0x37] ss:$-1 sm:$0xff] }
   0x6   :  { %66 = vst [vmem:[#allocation1] sm:$0xff] %v65_v10  ;;  %v107_v17 = vrot.slane %v106_v16, 1  ;;  %v120_v18 = vld [vmem:[#allocation0 + $0x47] ss:$-1 sm:$0xff]  ;;  %v134_v19 = vld [vmem:[#allocation0 + $0x57] ss:$-1 sm:$0xff] }
   0x7   :  { %80 = vst [vmem:[#allocation1 + $0x8] sm:$0xff] %v79_v14  ;;  %94 = vst [vmem:[#allocation1 + $0x10] sm:$0xff] %v93_v15  ;;  %v121_v20 = vrot.slane %v120_v18, 1  ;;  %v135_v21 = vrot.slane %v134_v19, 1  ;;  %v148_v22 = vld [vmem:[#allocation0 + $0x67] ss:$-1 sm:$0xff] }
   0x8   :  { %v162_v23 = vld [vmem:[#allocation0 + $0x77] ss:$-1 sm:$0xff]  ;;  %108 = vst [vmem:[#allocation1 + $0x18] sm:$0xff] %v107_v17  ;;  %v149_v24 = vrot.slane %v148_v22, 1 }
   0x9   :  { %v163_v25 = vrot.slane %v162_v23, 1  ;;  %v69_v26 = vld [vmem:[#allocation0 + $0xf] ss:$-1 sm:$0xff]  ;;  %v83_v27 = vld [vmem:[#allocation0 + $0x1f] ss:$-1 sm:$0xff]  ;;  %122 = vst [vmem:[#allocation1 + $0x20] sm:$0xff] %v121_v20 }
   0xa   :  { %v97_v28 = vld [vmem:[#allocation0 + $0x2f] ss:$-1 sm:$0xff]  ;;  %136 = vst [vmem:[#allocation1 + $0x28] sm:$0xff] %v135_v21  ;;  %v70_v29 = vrot.slane %v69_v26, 1  ;;  %v84_v30 = vrot.slane %v83_v27, 1  ;;  %150 = vst [vmem:[#allocation1 + $0x30] sm:$0xff] %v149_v24 }
   0xb   :  { %v98_v31 = vrot.slane %v97_v28, 1  ;;  %v111_v32 = vld [vmem:[#allocation0 + $0x3f] ss:$-1 sm:$0xff]  ;;  %164 = vst [vmem:[#allocation1 + $0x38] sm:$0xff] %v163_v25  ;;  %v125_v34 = vld [vmem:[#allocation0 + $0x4f] ss:$-1 sm:$0xff] }
   0xc   :  { %v112_v33 = vrot.slane %v111_v32, 1  ;;  %v139_v35 = vld [vmem:[#allocation0 + $0x5f] ss:$-1 sm:$0xff]  ;;  %74 = vst.msk [vmem:[#allocation1] sm:$0xff] %vm73_vm0, %v70_v29  ;;  %88 = vst.msk [vmem:[#allocation1 + $0x8] sm:$0xff] %vm73_vm0, %v84_v30  ;;  %v126_v36 = vrot.slane %v125_v34, 1 }
   0xd   :  { %102 = vst.msk [vmem:[#allocation1 + $0x10] sm:$0xff] %vm73_vm0, %v98_v31  ;;  %v140_v37 = vrot.slane %v139_v35, 1  ;;  %v153_v38 = vld [vmem:[#allocation0 + $0x6f] ss:$-1 sm:$0xff]  ;;  %v167_v39 = vld [vmem:[#allocation0 + $0x7f] ss:$-1 sm:$0xff] }
   0xe   :  { %116 = vst.msk [vmem:[#allocation1 + $0x18] sm:$0xff] %vm73_vm0, %v112_v33  ;;  %v154_v40 = vrot.slane %v153_v38, 1  ;;  %v168_v41 = vrot.slane %v167_v39, 1  ;;  %130 = vst.msk [vmem:[#allocation1 + $0x20] sm:$0xff] %vm73_vm0, %v126_v36 }
   0xf   :  { %144 = vst.msk [vmem:[#allocation1 + $0x28] sm:$0xff] %vm73_vm0, %v140_v37 }
  0x10   :  { %158 = vst.msk [vmem:[#allocation1 + $0x30] sm:$0xff] %vm73_vm0, %v154_v40  ;;  %172 = vst.msk [vmem:[#allocation1 + $0x38] sm:$0xff] %vm73_vm0, %v168_v41 }
  0x13   :  { %v214_v42 = vld [vmem:[#allocation1] sm:$0xff]  ;;  %v216_v43 = vld [vmem:[#allocation1 + $0x8] sm:$0xff] }
  0x14   :  { %v218_v44 = vld [vmem:[#allocation1 + $0x10] sm:$0xff]  ;;  %215 = vst [vmem:[%s330_s1] sm:$0xff] %v214_v42  ;;  %217 = vst [vmem:[%s330_s1 + $0x8] sm:$0xff] %v216_v43 }
  0x15   :  { %219 = vst [vmem:[%s330_s1 + $0x10] sm:$0xff] %v218_v44  ;;  %v220_v45 = vld [vmem:[#allocation1 + $0x18] sm:$0xff]  ;;  %v222_v46 = vld [vmem:[#allocation1 + $0x20] sm:$0xff] }
  0x16   :  { %221 = vst [vmem:[%s330_s1 + $0x18] sm:$0xff] %v220_v45  ;;  %v224_v47 = vld [vmem:[#allocation1 + $0x28] sm:$0xff]  ;;  %223 = vst [vmem:[%s330_s1 + $0x20] sm:$0xff] %v222_v46 }
  0x17   :  { %225 = vst [vmem:[%s330_s1 + $0x28] sm:$0xff] %v224_v47  ;;  %v226_v48 = vld [vmem:[#allocation1 + $0x30] sm:$0xff]  ;;  %v228_v49 = vld [vmem:[#allocation1 + $0x38] sm:$0xff] }
  0x18   :  { %227 = vst [vmem:[%s330_s1 + $0x30] sm:$0xff] %v226_v48  ;;  %229 = vst [vmem:[%s330_s1 + $0x38] sm:$0xff] %v228_v49 }

</bundles_post_ra>
